<compile_context>
chip_gen: v6e
topology: v6e:2x2x1
jax: 0.10.0
libtpu: 0.0.40
codegen_flags: <defaults>
</compile_context>

<pallas_src>
import math

import jax
import jax.numpy as jnp
from jax import lax
from jax.experimental import pallas as pl
from jax.experimental.pallas import tpu as pltpu

LN_EPS = 1e-5


# --------------------------------------------------------------------------
# helpers (f32 elementwise math)
# --------------------------------------------------------------------------
def _layernorm(x, g, b):
    mu = jnp.mean(x, axis=-1, keepdims=True)
    var = jnp.mean((x - mu) ** 2, axis=-1, keepdims=True)
    return (x - mu) * lax.rsqrt(var + LN_EPS) * g + b


def _gelu_tanh(x):
    c = math.sqrt(2.0 / math.pi)
    return 0.5 * x * (1.0 + jnp.tanh(c * (x + 0.044715 * x * x * x)))


def _pick_tile(n, cap):
    for c in (512, 256, 128, 64, 32, 16, 8):
        if c <= cap and n % c == 0:
            return c
    return n


# --------------------------------------------------------------------------
# kernel 1: fused LayerNorm1 + QKV projection -> lane-dense (B, S, E) bf16
#           (1/sqrt(D) scale already folded into the q columns of the weights)
# --------------------------------------------------------------------------
def qkv_kernel(x_ref, g_ref, b_ref, w_ref, bias_ref, q_ref, k_ref, v_ref):
    E = x_ref.shape[2]
    x = x_ref[0]                                           # (tq, E) f32
    h = _layernorm(x, g_ref[0], b_ref[0])                  # f32 statistics
    qkv = jnp.dot(h.astype(jnp.bfloat16), w_ref[...],
                  preferred_element_type=jnp.float32) + bias_ref[0]   # (tq, 3E)
    q_ref[0] = qkv[:, 0:E].astype(jnp.bfloat16)            # single dense store
    k_ref[0] = qkv[:, E:2 * E].astype(jnp.bfloat16)
    v_ref[0] = qkv[:, 2 * E:3 * E].astype(jnp.bfloat16)


# --------------------------------------------------------------------------
# kernel 2: flash causal attention + fused output projection + residual
# --------------------------------------------------------------------------
def make_attn_kernel(H, D, tq, tk):
    E = H * D

    def attn_kernel(q_ref, k_ref, v_ref, x_ref, wproj_ref, bproj_ref, o_ref,
                    m_sc, l_sc, acc_sc):
        ki = pl.program_id(2)
        q_start = pl.program_id(1) * tq
        k_start = ki * tk
        last_k = (q_start + tq - 1) // tk        # last causally-valid k block

        @pl.when(ki == 0)
        def _init():
            m_sc[...] = jnp.full_like(m_sc, -jnp.inf)
            l_sc[...] = jnp.zeros_like(l_sc)
            acc_sc[...] = jnp.zeros_like(acc_sc)

        def flash_step(masked):
            q = q_ref[0]                         # (tq, E) bf16 (pre-scaled)
            k = k_ref[0]                         # (tk, E) bf16
            v = v_ref[0]                         # (tk, E) bf16
            if masked:
                row = q_start + lax.broadcasted_iota(jnp.int32, (tq, tk), 0)
                col = k_start + lax.broadcasted_iota(jnp.int32, (tq, tk), 1)
                neg = jnp.where(col <= row,
                                jnp.float32(0.0), jnp.float32(-1e30))
            for h in range(H):                   # static unroll over heads
                sl = slice(h * D, (h + 1) * D)
                s = lax.dot_general(q[:, sl], k[:, sl],
                                    (((1,), (1,)), ((), ())),
                                    preferred_element_type=jnp.float32)  # (tq, tk)
                if masked:
                    s = s + neg
                m_prev = m_sc[:, h:h + 1]                            # (tq, 1)
                m_new = jnp.maximum(m_prev, s.max(axis=-1, keepdims=True))
                alpha = jnp.exp(m_prev - m_new)
                p = jnp.exp(s - m_new)                               # (tq, tk)
                l_sc[:, h:h + 1] = alpha * l_sc[:, h:h + 1] + p.sum(
                    axis=-1, keepdims=True)
                acc_sc[:, sl] = alpha * acc_sc[:, sl] + jnp.dot(
                    p.astype(jnp.bfloat16), v[:, sl],
                    preferred_element_type=jnp.float32)
                m_sc[:, h:h + 1] = m_new

        # interior tile: every (row, col) pair is causally valid -> no mask.
        interior = (k_start + tk - 1) <= q_start
        # diagonal-straddling tile: partially valid -> apply mask.
        diagonal = jnp.logical_and(k_start <= q_start + tq - 1,
                                   (k_start + tk - 1) > q_start)

        @pl.when(interior)
        def _interior():
            flash_step(masked=False)

        @pl.when(diagonal)
        def _diag():
            flash_step(masked=True)

        @pl.when(ki == last_k)
        def _finalize():
            inv = pl.reciprocal(l_sc[...], approx=True)              # (tq, H)
            parts = [acc_sc[:, h * D:(h + 1) * D] * inv[:, h:h + 1]
                     for h in range(H)]
            y = jnp.concatenate(parts, axis=1).astype(jnp.bfloat16)  # (tq, E)
            # single E-deep output projection (heads already concatenated).
            o_ref[0] = (x_ref[0]
                        + jnp.dot(y, wproj_ref[...],
                                  preferred_element_type=jnp.float32)
                        + bproj_ref[0])

    return attn_kernel


# --------------------------------------------------------------------------
# kernel 3: LayerNorm2 + MLP (resident weights, in-kernel hidden chunking)
#           + residual
# --------------------------------------------------------------------------
def make_mlp_kernel(th):
    def mlp_kernel(x_ref, g_ref, b_ref, wfc_ref, bfc_ref, wproj_ref,
                   bproj_ref, o_ref):
        E = x_ref.shape[2]
        F = wfc_ref.shape[1]
        x = x_ref[0]                                            # (tq, E) f32
        hn = _layernorm(x, g_ref[0], b_ref[0]).astype(jnp.bfloat16)
        bfc = bfc_ref[0]                                        # (F,) f32
        acc = jnp.zeros((x.shape[0], E), jnp.float32)
        for t in range(F // th):                                # static unroll
            sl = slice(t * th, (t + 1) * th)
            f = jnp.dot(hn, wfc_ref[:, sl],
                        preferred_element_type=jnp.float32) + bfc[sl]
            f = _gelu_tanh(f)                                   # f32 GELU
            acc = acc + jnp.dot(f.astype(jnp.bfloat16), wproj_ref[sl, :],
                                preferred_element_type=jnp.float32)
        o_ref[0] = x + acc + bproj_ref[0]

    return mlp_kernel


# --------------------------------------------------------------------------
# wrapper
# --------------------------------------------------------------------------
def block_forward(x, params, n_head, *, tq=None, tk=None, tq_mlp=None, th=None,
                  vmem_limit_bytes=48 * 1024 * 1024):
    (ln1_g, ln1_b, w_attn, b_attn, w_proj, b_proj,
     ln2_g, ln2_b, w_fc, b_fc, w_fcproj, b_fcproj) = params
    B, S, E = x.shape
    H = n_head
    assert E % H == 0
    D = E // H
    F = 4 * E

    tq = _pick_tile(S, 256) if tq is None else tq
    tk = _pick_tile(S, 256) if tk is None else tk
    tq_mlp = _pick_tile(S, 256) if tq_mlp is None else tq_mlp
    th = _pick_tile(F, 512) if th is None else th
    assert S % tq == 0 and S % tk == 0 and S % tq_mlp == 0 and F % th == 0
    n_q, n_k = S // tq, S // tk

    # Fold the 1/sqrt(D) attention scale into the q-columns of the QKV weights
    # (and bias) at the same place they are cast to bf16 for the MXU.
    scale = 1.0 / math.sqrt(D)
    w_attn_bf = w_attn.at[:, :E].multiply(scale).astype(jnp.bfloat16)
    b_attn_s = b_attn.at[:, :E].multiply(scale)
    w_proj_bf = w_proj.astype(jnp.bfloat16)
    w_fc_bf = w_fc.astype(jnp.bfloat16)
    w_fcproj_bf = w_fcproj.astype(jnp.bfloat16)

    def cp(sem):
        return pltpu.CompilerParams(dimension_semantics=sem,
                                    vmem_limit_bytes=vmem_limit_bytes)

    # ---- 1) fused LayerNorm1 + QKV projection (lane-dense bf16 q/k/v) ------
    qkv_shape = jax.ShapeDtypeStruct((B, S, E), jnp.bfloat16)
    q, k, v = pl.pallas_call(
        qkv_kernel,
        out_shape=(qkv_shape, qkv_shape, qkv_shape),
        grid=(B, n_q),
        in_specs=[
            pl.BlockSpec((1, tq, E), lambda b, i: (b, i, 0)),
            pl.BlockSpec((1, E), lambda b, i: (0, 0)),
            pl.BlockSpec((1, E), lambda b, i: (0, 0)),
            pl.BlockSpec((E, 3 * E), lambda b, i: (0, 0)),
            pl.BlockSpec((1, 3 * E), lambda b, i: (0, 0)),
        ],
        out_specs=(
            pl.BlockSpec((1, tq, E), lambda b, i: (b, i, 0)),
            pl.BlockSpec((1, tq, E), lambda b, i: (b, i, 0)),
            pl.BlockSpec((1, tq, E), lambda b, i: (b, i, 0)),
        ),
        compiler_params=cp(("parallel", "parallel")),
    )(x, ln1_g, ln1_b, w_attn_bf, b_attn_s)

    # ---- 2) flash causal attention + output projection + residual ----------
    # Clamp the K/V block index to the last causally-valid tile: repeated
    # block indices make Pallas elide the DMA, so the upper-triangular half
    # of K/V is never fetched from HBM.
    def kv_map(b, i, j):
        return (b, jnp.minimum(j, (i * tq + tq - 1) // tk), 0)

    x_attn = pl.pallas_call(
        make_attn_kernel(H, D, tq, tk),
        out_shape=jax.ShapeDtypeStruct((B, S, E), jnp.float32),
        grid=(B, n_q, n_k),
        in_specs=[
            pl.BlockSpec((1, tq, E), lambda b, i, j: (b, i, 0)),
            pl.BlockSpec((1, tk, E), kv_map),
            pl.BlockSpec((1, tk, E), kv_map),
            pl.BlockSpec((1, tq, E), lambda b, i, j: (b, i, 0)),
            pl.BlockSpec((E, E), lambda b, i, j: (0, 0)),
            pl.BlockSpec((1, E), lambda b, i, j: (0, 0)),
        ],
        out_specs=pl.BlockSpec((1, tq, E), lambda b, i, j: (b, i, 0)),
        scratch_shapes=[
            pltpu.VMEM((tq, H), jnp.float32),    # running max (lane = heads)
            pltpu.VMEM((tq, H), jnp.float32),    # running sum
            pltpu.VMEM((tq, E), jnp.float32),    # lane-dense output accumulator
        ],
        compiler_params=cp(("parallel", "parallel", "arbitrary")),
    )(q, k, v, x, w_proj_bf, b_proj)

    # ---- 3) LayerNorm2 + MLP (resident weights) + residual ------------------
    out = pl.pallas_call(
        make_mlp_kernel(th),
        out_shape=jax.ShapeDtypeStruct((B, S, E), jnp.float32),
        grid=(B, S // tq_mlp),
        in_specs=[
            pl.BlockSpec((1, tq_mlp, E), lambda b, i: (b, i, 0)),
            pl.BlockSpec((1, E), lambda b, i: (0, 0)),
            pl.BlockSpec((1, E), lambda b, i: (0, 0)),
            pl.BlockSpec((E, F), lambda b, i: (0, 0)),     # resident, fetched once
            pl.BlockSpec((1, F), lambda b, i: (0, 0)),
            pl.BlockSpec((F, E), lambda b, i: (0, 0)),     # resident, fetched once
            pl.BlockSpec((1, E), lambda b, i: (0, 0)),
        ],
        out_specs=pl.BlockSpec((1, tq_mlp, E), lambda b, i: (b, i, 0)),
        compiler_params=cp(("parallel", "parallel")),
    )(x_attn, ln2_g, ln2_b, w_fc_bf, b_fc, w_fcproj_bf, b_fcproj)

    return out


# ---------------- pure-JAX reference (for correctness check) ----------------
def block_ref(x, params, n_head):
    (ln1_g, ln1_b, w_attn, b_attn, w_proj, b_proj,
     ln2_g, ln2_b, w_fc, b_fc, w_fcproj, b_fcproj) = params
    B, S, E = x.shape
    D = E // n_head

    h = _layernorm(x, ln1_g[0], ln1_b[0])
    qkv = h @ w_attn + b_attn[0]
    q, k, v = jnp.split(qkv, 3, axis=-1)
    q = q.reshape(B, S, n_head, D).transpose(0, 2, 1, 3)
    k = k.reshape(B, S, n_head, D).transpose(0, 2, 1, 3)
    v = v.reshape(B, S, n_head, D).transpose(0, 2, 1, 3)
    s = jnp.einsum("bhqd,bhkd->bhqk", q, k) / math.sqrt(D)
    mask = jnp.tril(jnp.ones((S, S), bool))
    s = jnp.where(mask, s, -jnp.inf)
    p = jax.nn.softmax(s, axis=-1)
    y = jnp.einsum("bhqk,bhkd->bhqd", p, v)
    y = y.transpose(0, 2, 1, 3).reshape(B, S, E)
    y = y @ w_proj + b_proj[0]
    x = x + y

    h2 = _layernorm(x, ln2_g[0], ln2_b[0])
    f = _gelu_tanh(h2 @ w_fc + b_fc[0])
    m = f @ w_fcproj + b_fcproj[0]
    return x + m


def make_params(key, n_embd):
    E = n_embd
    ks = jax.random.split(key, 4)
    std = 0.02
    ln1_g = jnp.ones((1, E), jnp.float32)
    ln1_b = jnp.zeros((1, E), jnp.float32)
    w_attn = std * jax.random.normal(ks[0], (E, 3 * E), jnp.float32)
    b_attn = jnp.zeros((1, 3 * E), jnp.float32)
    w_proj = std * jax.random.normal(ks[1], (E, E), jnp.float32)
    b_proj = jnp.zeros((1, E), jnp.float32)
    ln2_g = jnp.ones((1, E), jnp.float32)
    ln2_b = jnp.zeros((1, E), jnp.float32)
    w_fc = std * jax.random.normal(ks[2], (E, 4 * E), jnp.float32)
    b_fc = jnp.zeros((1, 4 * E), jnp.float32)
    w_fcproj = std * jax.random.normal(ks[3], (4 * E, E), jnp.float32)
    b_fcproj = jnp.zeros((1, E), jnp.float32)
    return (ln1_g, ln1_b, w_attn, b_attn, w_proj, b_proj,
            ln2_g, ln2_b, w_fc, b_fc, w_fcproj, b_fcproj)


if __name__ == "__main__":
    # Small but layout-friendly demo: bf16-native (16, 128)-aligned tiles,
    # D = 64, multi-tile flash loop exercising the clamped causal K/V fetch
    # (q-tile 0 touches only k-tile 0) and the MLP hidden-chunk loop.
    B, S, E, H = 2, 64, 256, 4
    key = jax.random.PRNGKey(0)
    kx, kp = jax.random.split(key)
    x = jax.random.normal(kx, (B, S, E), jnp.float32)
    params = make_params(kp, E)

    out = block_forward(x, params, n_head=H, tq=16, tk=16, tq_mlp=32, th=512)
    out = jax.block_until_ready(out)

    ref = block_ref(x, params, n_head=H)
    assert out.shape == (B, S, E)
    max_err = float(jnp.max(jnp.abs(out - ref)))
    # bf16 matmul operands with f32 accumulation vs. f32 reference.
    assert jnp.allclose(out, ref, rtol=2e-2, atol=2e-2), max_err

    print("KERNEL_OK")
</pallas_src>

<mosaic_0001>
module attributes {stable_mosaic.version = 11 : i64} {
  func.func @qkv_kernel(%arg0: i32, %arg1: i32, %arg2: memref<1x16x256xf32, #tpu.memory_space<vmem>>, %arg3: memref<1x256xf32, #tpu.memory_space<vmem>>, %arg4: memref<1x256xf32, #tpu.memory_space<vmem>>, %arg5: memref<256x768xbf16, #tpu.memory_space<vmem>>, %arg6: memref<1x768xf32, #tpu.memory_space<vmem>>, %arg7: memref<1x16x256xbf16, #tpu.memory_space<vmem>>, %arg8: memref<1x16x256xbf16, #tpu.memory_space<vmem>>, %arg9: memref<1x16x256xbf16, #tpu.memory_space<vmem>>) attributes {dimension_semantics = [#tpu.dimension_semantics<parallel>, #tpu.dimension_semantics<parallel>], iteration_bounds = array<i64: 2, 4>, scalar_prefetch = 0 : i64, scratch_operands = 0 : i64, tpu.core_type = #tpu.core_type<tc>, window_params = [{transform_indices = @transform_0, window_bounds = array<i64: 1, 16, 256>}, {pipeline_mode = #tpu.pipeline_mode<synchronous>, transform_indices = @transform_1, window_bounds = array<i64: 1, 256>}, {pipeline_mode = #tpu.pipeline_mode<synchronous>, transform_indices = @transform_2, window_bounds = array<i64: 1, 256>}, {pipeline_mode = #tpu.pipeline_mode<synchronous>, transform_indices = @transform_3, window_bounds = array<i64: 256, 768>}, {pipeline_mode = #tpu.pipeline_mode<synchronous>, transform_indices = @transform_4, window_bounds = array<i64: 1, 768>}, {transform_indices = @transform_5, window_bounds = array<i64: 1, 16, 256>}, {transform_indices = @transform_6, window_bounds = array<i64: 1, 16, 256>}, {transform_indices = @transform_7, window_bounds = array<i64: 1, 16, 256>}]} {
    %c0 = arith.constant 0 : index
    %c0_0 = arith.constant 0 : index
    %c0_1 = arith.constant 0 : index
    %0 = vector.load %arg2[%c0, %c0_0, %c0_1] : memref<1x16x256xf32, #tpu.memory_space<vmem>>, vector<1x16x256xf32>
    %1 = vector.shape_cast %0 : vector<1x16x256xf32> to vector<16x256xf32>
    %c0_2 = arith.constant 0 : index
    %c0_3 = arith.constant 0 : index
    %2 = vector.load %arg3[%c0_2, %c0_3] : memref<1x256xf32, #tpu.memory_space<vmem>>, vector<1x256xf32>
    %3 = vector.shape_cast %2 : vector<1x256xf32> to vector<256xf32>
    %c0_4 = arith.constant 0 : index
    %c0_5 = arith.constant 0 : index
    %4 = vector.load %arg4[%c0_4, %c0_5] : memref<1x256xf32, #tpu.memory_space<vmem>>, vector<1x256xf32>
    %5 = vector.shape_cast %4 : vector<1x256xf32> to vector<256xf32>
    %cst = arith.constant dense<0.000000e+00> : vector<16xf32>
    %6 = vector.multi_reduction <add>, %1, %cst [1] : vector<16x256xf32> to vector<16xf32>
    %7 = vector.shape_cast %6 : vector<16xf32> to vector<16x1xf32>
    %cst_6 = arith.constant 2.560000e+02 : f32
    %8 = vector.broadcast %cst_6 : f32 to vector<16x1xf32>
    %9 = arith.divf %7, %8 : vector<16x1xf32>
    %10 = vector.broadcast %9 : vector<16x1xf32> to vector<16x256xf32>
    %11 = arith.subf %1, %10 : vector<16x256xf32>
    %12 = arith.mulf %11, %11 : vector<16x256xf32>
    %cst_7 = arith.constant dense<0.000000e+00> : vector<16xf32>
    %13 = vector.multi_reduction <add>, %12, %cst_7 [1] : vector<16x256xf32> to vector<16xf32>
    %14 = vector.shape_cast %13 : vector<16xf32> to vector<16x1xf32>
    %cst_8 = arith.constant 2.560000e+02 : f32
    %15 = vector.broadcast %cst_8 : f32 to vector<16x1xf32>
    %16 = arith.divf %14, %15 : vector<16x1xf32>
    %17 = vector.broadcast %9 : vector<16x1xf32> to vector<16x256xf32>
    %18 = arith.subf %1, %17 : vector<16x256xf32>
    %cst_9 = arith.constant 9.99999974E-6 : f32
    %19 = vector.broadcast %cst_9 : f32 to vector<16x1xf32>
    %20 = arith.addf %16, %19 : vector<16x1xf32>
    %21 = math.rsqrt %20 : vector<16x1xf32>
    %22 = vector.broadcast %21 : vector<16x1xf32> to vector<16x256xf32>
    %23 = arith.mulf %18, %22 : vector<16x256xf32>
    %24 = vector.shape_cast %3 : vector<256xf32> to vector<1x256xf32>
    %25 = vector.broadcast %24 : vector<1x256xf32> to vector<16x256xf32>
    %26 = arith.mulf %23, %25 : vector<16x256xf32>
    %27 = vector.shape_cast %5 : vector<256xf32> to vector<1x256xf32>
    %28 = vector.broadcast %27 : vector<1x256xf32> to vector<16x256xf32>
    %29 = arith.addf %26, %28 : vector<16x256xf32>
    %30 = arith.truncf %29 : vector<16x256xf32> to vector<16x256xbf16>
    %c0_10 = arith.constant 0 : index
    %c0_11 = arith.constant 0 : index
    %31 = vector.load %arg5[%c0_10, %c0_11] : memref<256x768xbf16, #tpu.memory_space<vmem>>, vector<256x768xbf16>
    %cst_12 = arith.constant dense<0.000000e+00> : vector<16x768xf32>
    %32 = tpu.matmul %30, %31, %cst_12 {dimension_numbers = #tpu.dot_dimension_numbers<[1], [0], [0], [1], [0, 0, 1, 1], [], []>} : vector<16x256xbf16>, vector<256x768xbf16>, vector<16x768xf32> -> vector<16x768xf32>
    %c0_13 = arith.constant 0 : index
    %c0_14 = arith.constant 0 : index
    %33 = vector.load %arg6[%c0_13, %c0_14] : memref<1x768xf32, #tpu.memory_space<vmem>>, vector<1x768xf32>
    %34 = vector.shape_cast %33 : vector<1x768xf32> to vector<768xf32>
    %35 = vector.shape_cast %34 : vector<768xf32> to vector<1x768xf32>
    %36 = vector.broadcast %35 : vector<1x768xf32> to vector<16x768xf32>
    %37 = arith.addf %32, %36 : vector<16x768xf32>
    %38 = vector.extract_strided_slice %37 {offsets = [0, 0], sizes = [16, 256], strides = [1, 1]} : vector<16x768xf32> to vector<16x256xf32>
    %39 = arith.truncf %38 : vector<16x256xf32> to vector<16x256xbf16>
    %c0_15 = arith.constant 0 : index
    %c0_16 = arith.constant 0 : index
    %c0_17 = arith.constant 0 : index
    %40 = vector.load %arg7[%c0_15, %c0_16, %c0_17] : memref<1x16x256xbf16, #tpu.memory_space<vmem>>, vector<1x16x256xbf16>
    %41 = vector.shape_cast %40 : vector<1x16x256xbf16> to vector<16x256xbf16>
    %42 = vector.shape_cast %39 : vector<16x256xbf16> to vector<1x16x256xbf16>
    tpu.vector_store %arg7[%c0_15, %c0_16, %c0_17], %42 {strides = array<i32>} : memref<1x16x256xbf16, #tpu.memory_space<vmem>>, vector<1x16x256xbf16>,
    %43 = vector.extract_strided_slice %37 {offsets = [0, 256], sizes = [16, 256], strides = [1, 1]} : vector<16x768xf32> to vector<16x256xf32>
    %44 = arith.truncf %43 : vector<16x256xf32> to vector<16x256xbf16>
    %c0_18 = arith.constant 0 : index
    %c0_19 = arith.constant 0 : index
    %c0_20 = arith.constant 0 : index
    %45 = vector.load %arg8[%c0_18, %c0_19, %c0_20] : memref<1x16x256xbf16, #tpu.memory_space<vmem>>, vector<1x16x256xbf16>
    %46 = vector.shape_cast %45 : vector<1x16x256xbf16> to vector<16x256xbf16>
    %47 = vector.shape_cast %44 : vector<16x256xbf16> to vector<1x16x256xbf16>
    tpu.vector_store %arg8[%c0_18, %c0_19, %c0_20], %47 {strides = array<i32>} : memref<1x16x256xbf16, #tpu.memory_space<vmem>>, vector<1x16x256xbf16>,
    %48 = vector.extract_strided_slice %37 {offsets = [0, 512], sizes = [16, 256], strides = [1, 1]} : vector<16x768xf32> to vector<16x256xf32>
    %49 = arith.truncf %48 : vector<16x256xf32> to vector<16x256xbf16>
    %c0_21 = arith.constant 0 : index
    %c0_22 = arith.constant 0 : index
    %c0_23 = arith.constant 0 : index
    %50 = vector.load %arg9[%c0_21, %c0_22, %c0_23] : memref<1x16x256xbf16, #tpu.memory_space<vmem>>, vector<1x16x256xbf16>
    %51 = vector.shape_cast %50 : vector<1x16x256xbf16> to vector<16x256xbf16>
    %52 = vector.shape_cast %49 : vector<16x256xbf16> to vector<1x16x256xbf16>
    tpu.vector_store %arg9[%c0_21, %c0_22, %c0_23], %52 {strides = array<i32>} : memref<1x16x256xbf16, #tpu.memory_space<vmem>>, vector<1x16x256xbf16>,
    return
  }
  func.func @transform_0(%arg0: i32, %arg1: i32) -> (i32, i32, i32) {
    %c0_i32 = arith.constant 0 : i32
    %c0_i32_0 = arith.constant 0 : i32
    return %arg0, %arg1, %c0_i32 : i32, i32, i32
  }
  func.func @transform_1(%arg0: i32, %arg1: i32) -> (i32, i32) {
    %c0_i32 = arith.constant 0 : i32
    %c0_i32_0 = arith.constant 0 : i32
    %c0_i32_1 = arith.constant 0 : i32
    return %c0_i32, %c0_i32_0 : i32, i32
  }
  func.func @transform_2(%arg0: i32, %arg1: i32) -> (i32, i32) {
    %c0_i32 = arith.constant 0 : i32
    %c0_i32_0 = arith.constant 0 : i32
    %c0_i32_1 = arith.constant 0 : i32
    return %c0_i32, %c0_i32_0 : i32, i32
  }
  func.func @transform_3(%arg0: i32, %arg1: i32) -> (i32, i32) {
    %c0_i32 = arith.constant 0 : i32
    %c0_i32_0 = arith.constant 0 : i32
    %c0_i32_1 = arith.constant 0 : i32
    return %c0_i32, %c0_i32_0 : i32, i32
  }
  func.func @transform_4(%arg0: i32, %arg1: i32) -> (i32, i32) {
    %c0_i32 = arith.constant 0 : i32
    %c0_i32_0 = arith.constant 0 : i32
    %c0_i32_1 = arith.constant 0 : i32
    return %c0_i32, %c0_i32_0 : i32, i32
  }
  func.func @transform_5(%arg0: i32, %arg1: i32) -> (i32, i32, i32) {
    %c0_i32 = arith.constant 0 : i32
    %c0_i32_0 = arith.constant 0 : i32
    return %arg0, %arg1, %c0_i32 : i32, i32, i32
  }
  func.func @transform_6(%arg0: i32, %arg1: i32) -> (i32, i32, i32) {
    %c0_i32 = arith.constant 0 : i32
    %c0_i32_0 = arith.constant 0 : i32
    return %arg0, %arg1, %c0_i32 : i32, i32, i32
  }
  func.func @transform_7(%arg0: i32, %arg1: i32) -> (i32, i32, i32) {
    %c0_i32 = arith.constant 0 : i32
    %c0_i32_0 = arith.constant 0 : i32
    return %arg0, %arg1, %c0_i32 : i32, i32, i32
  }
}

</mosaic_0001>

<bundles_post_ra>
// kernel: tpu_custom_call.1
= control target key start
LH: loop header
LB: loop body
LE: loop exit
PB: predicated region body
PF: predicated region fallthrough
CT: control target
= control target key end

     0   :  { %s2608_s0 = inlined_call_operand.hbm [shape: f32[2,64,256], index: 0, kind: input, shape index: {}]   ;;  %s2609_s1 = inlined_call_operand.hbm [shape: f32[1,256], index: 1, kind: input, shape index: {}]   ;;  %s2610_s2 = inlined_call_operand.hbm [shape: f32[1,256], index: 2, kind: input, shape index: {}]   ;;  %s2611_s3 = inlined_call_operand.hbm [shape: bf16[256,768], index: 3, kind: input, shape index: {}]   ;;  %s2612_s4 = inlined_call_operand.vmem [shape: f32[1,768], index: 4, kind: input, shape index: {}]   ;;  %s2613_s5 = inlined_call_operand.hbm [shape: bf16[2,64,256], index: 5, kind: output, shape index: {0}]   ;;  %s2614_s6 = inlined_call_operand.hbm [shape: bf16[2,64,256], index: 6, kind: output, shape index: {1}]   ;;  %s2615_s7 = inlined_call_operand.hbm [shape: bf16[2,64,256], index: 7, kind: output, shape index: {2}]  }
   0x1   :  { %2626 = sst [smem:[#allocation23_spill]] %s2609_s1 }
   0x2   :  { %2627 = sst [smem:[#allocation24_spill]] %s2610_s2 }
   0x3   :  { %2628 = sst [smem:[#allocation25_spill]] %s2611_s3 }
   0x4   :  { %2629 = sst [smem:[#allocation26_spill]] %s2613_s5 }
   0x5   :  { %2630 = sst [smem:[#allocation27_spill]] %s2615_s7 }
   0x6   :  { %13 = vsyncpa [#allocation3], 0 }
   0x7   :  { %15 = vsyncpa [#allocation3 + $0x1], 0 }
   0x8   :  { %16 = vsyncpa [#allocation6], 0 }
   0x9   :  { %17 = vsyncpa [#allocation9], 0 }
   0xa   :  { %18 = vsyncpa [#allocation4], 0 }
   0xb   :  { %20 = vsyncpa [#allocation4 + $0x1], 0 }
   0xc   :  { %21 = vsyncpa [#allocation12], 0 }
   0xd   :  { %23 = vsyncpa [#allocation12 + $0x1], 0  ;;  %s2226_s24 = smov 0   ;;  %s2228_s25 = smov 0  }
   0xe   :  { %s2230_s26 = smov 0   ;;  %s2232_s27 = smov 0  }
   0xf   :  { %s2234_s28 = smov 0   ;;  %s2236_s29 = smov 0  }
  0x10   :  { %s2238_s30 = smov 0   ;;  %s2240_s8 = smov 0  }
  0x11 LB: > { %2631 = sst [smem:[#allocation19_spill]] %s2143_s24  ;;  %s2267_s9 = sadd.s32 4294967295, %s2171_s8   ;;  %s2171_s8 = sphi %s2240_s8, %s29_s8   ;;  %s2167_s30 = sphi %s2238_s30, %s2665_s30   ;;  %s2163_s29 = sphi %s2236_s29, %s2660_s29   ;;  %s2159_s28 = sphi %s2234_s28, %s2664_s28   ;;  %s2155_s27 = sphi %s2232_s27, %s2659_s27   ;;  %s2151_s26 = sphi %s2230_s26, %s2663_s26   ;;  %s2147_s25 = sphi %s2228_s25, %s2662_s25   ;;  %s2143_s24 = sphi %s2226_s24, %s2661_s24  }
  0x12   : > { %2632 = sst [smem:[#allocation20_spill]] %s2163_s29  ;;  %s2619_s10 = sadd.s32 4294967294, %s2171_s8  }
  0x13   : > { %p63_p0 = scmp.ne.s32.totalorder %s2147_s25, %s2143_s24  ;;  %p2616_p1 = scmp.eq.s32.totalorder %s2267_s9, 0 }
  0x14   : > { %p179_p3 = scmp.eq.s32.totalorder %s2619_s10, 7  ;;  %p1485_p5 = scmp.ge.s32.totalorder %s2171_s8, 1 }
  0x15   : > { %p2278_p4 = por %p2616_p1, %p63_p0  ;;  %p242_p7 = scmp.lt.s32.totalorder %s2171_s8, 9 }
  0x16   : > { %p2283_p6 = por %p179_p3, %p63_p0  ;;  %s2173_s14 = smov [#allocation5]  }
  0x17   : > { %s2633_s11 = scalar_select %p2278_p4, 1, 0 }
  0x18   : > { %s2634_s12 = scalar_select %p2283_p6, 1, 0 }
  0x19   : > { %p2288_p8 = pnand %p1485_p5, %p242_p7  ;;  %s255_s15 = sshll.u32 %s2173_s14, 4  ;;  %s256_s15 = int_to_ptr.vmem [resolvable:$true] %s255_s15 }
  0x1a   : > { %2635 = sst [smem:[#allocation21_spill]] %s2634_s12  ;;  %s2174_s16 = smov [#allocation7]  }
  0x1b   : > { %s2636_s13 = scalar_select %p2288_p8, 1, 0 }
  0x1c   : > { %p1652_p9 = pneg %p2288_p8  ;;  %s266_s17 = sshll.u32 %s2174_s16, 4  ;;  %s267_s17 = int_to_ptr.vmem [resolvable:$true] %s266_s17 }
  0x1d   : > { %s2175_s19 = smov [#allocation8]   ;;  %s1916_s21 = scalar_lea.vmem %s256_s15, 32 }
  0x1e   : > { %p2296_p10 = pnand %p1652_p9, %p2616_p1  ;;  %s276_s20 = sshll.u32 %s2175_s19, 4  ;;  %s2300_s20 = int_to_ptr.vmem [resolvable:$true] %s276_s20 }
  0x1f   : > { %p1917_p12 = scmp.ne.s32.totalorder %s256_s15, %s1916_s21  ;;  %p1924_p3 = scmp.lt.s32.totalorder %s256_s15, %s256_s15 }
  0x20   : > { %p1907_p11 = pneg %p2296_p10  ;;  %p1925_p5 = scmp.lt.s32.totalorder %s1916_s21, %s1916_s21 }
  0x22   : > { %p1919_p13 = pnand %p1917_p12, %p1907_p11  ;;  %p1926_p7 = por %p1925_p5, %p1924_p3 }
  0x24   : > { %p1920_p0 = pneg %p1919_p13 }
  0x26   : > { %p1927_p9 = pnand %p1926_p7, %p1920_p0 }
  0x28   : > { %1930 = shalt.err (!%p1927_p9)
}
  0x29   : > { %s2638_s1 = sld [smem:[#allocation23_spill]]  ;;  %s1942_s14 = scalar_lea.vmem %s267_s17, 32 }
  0x2a   : > { %p1943_p1 = scmp.ne.s32.totalorder %s267_s17, %s1942_s14  ;;  %p1950_p12 = scmp.lt.s32.totalorder %s267_s17, %s267_s17 }
  0x2b   : > { %p1951_p13 = scmp.lt.s32.totalorder %s1942_s14, %s1942_s14 }
  0x2c   : > { %p1945_p2 = pnand %p1943_p1, %p1907_p11 }
  0x2d   : > { %p1952_p4 = por %p1951_p13, %p1950_p12 }
  0x2e   : > { %p1946_p6 = pneg %p1945_p2 }
  0x2f   : > { %1655 = dma.hbm_to_vmem [thread:$0]  (!%p2296_p10), %s2638_s1, 32, %s256_s15, [#allocation6]  }
  0x30   : > { %p1953_p8 = pnand %p1952_p4, %p1946_p6 }
  0x32   : > { %1956 = shalt.err (!%p1953_p8)
}
  0x33   : > { %s2639_s2 = sld [smem:[#allocation24_spill]]  ;;  %s1968_s15 = scalar_lea.vmem %s2300_s20, 12288 }
  0x34   : > { %p1969_p0 = scmp.ne.s32.totalorder %s2300_s20, %s1968_s15  ;;  %p1976_p3 = scmp.lt.s32.totalorder %s2300_s20, %s2300_s20 }
  0x35   : > { %p1977_p4 = scmp.lt.s32.totalorder %s1968_s15, %s1968_s15 }
  0x36   : > { %p1971_p1 = pnand %p1969_p0, %p1907_p11 }
  0x37   : > { %p1978_p6 = por %p1977_p4, %p1976_p3 }
  0x38   : > { %p1972_p2 = pneg %p1971_p1 }
  0x39   : > { %1658 = dma.hbm_to_vmem [thread:$0]  (!%p2296_p10), %s2639_s2, 32, %s267_s17, [#allocation6]  }
  0x3a   : > { %p1979_p8 = pnand %p1978_p6, %p1972_p2 }
  0x3c   : > { %1982 = shalt.err (!%p1979_p8)
}
  0x3d   : > { %s2176_s21 = smov 384   ;;  %s2177_s17 = smov 24  }
  0x3e   : > { %s2640_s3 = sld [smem:[#allocation25_spill]]  ;;  %s38_s14 = sadd.s32 1, %s2163_s29 }
  0x3f   : > { %p39_p11 = scmp.ge.s32.totalorder %s38_s14, 4  ;;  %s41_s16 = sadd.s32 1, %s2167_s30 }
  0x40   : > { %s50_s19 = sadd.s32 1, %s2151_s26  ;;  %p57_p5 = scmp.ne.s32.totalorder %s2151_s26, %s2147_s25 }
  0x41   : > { %s2667_s14 = smov (%p39_p11, %s38_s14), 0  ;;  %s2669_s16 = smov (!%p39_p11, %s41_s16), %s2167_s30 }
  0x42   : > { %2641 = sst [smem:[#allocation22_spill]] %s2667_s14  ;;  %s46_s15 = ssub.s32 %s2163_s29, %s2667_s14 }
  0x43   : > { %p58_p7 = scmp.eq.s32.totalorder %s2171_s8, 0  ;;  %p43_p9 = scmp.ge.s32.totalorder %s2669_s16, 2 }
  0x44   : > { %1661 = dma.hbm_to_vmem [thread:$0]  (!%p2296_p10), %s2640_s3, 12288, %s2300_s20, [#allocation9], %s2176_s21, %s2176_s21, %s2177_s17  }
  0x45   : > { %p2642_p12 = scmp.eq.s32.totalorder %s2267_s9, 7  ;;  %p2350_p10 = por %p58_p7, %p57_p5 }
  0x46   : > { %p1679_p0 = scmp.lt.s32.totalorder %s2171_s8, 8  ;;  %s2671_s16 = smov (%p43_p9, %s2669_s16), 0 }
  0x47   : > { %p2346_p13 = por %p2642_p12, %p57_p5  ;;  %s293_s21 = sand.u32 1, %s2151_s26  }
  0x48   : > { %s1622_s17 = sshll.u32 %s2163_s29, 2  ;;  %s45_s22 = ssub.s32 %s2167_s30, %s2671_s16 }
  0x49   : > { %s47_s23 = sor.u32 %s46_s15, %s45_s22  ;;  %s1490_s10 = sshll.u32 %s293_s21, 5 }
  0x4a   : > { %p48_p1 = scmp.eq.s32.totalorder %s47_s23, 0  ;;  %s1493_s1 = sshll.u32 %s2167_s30, 4 }
  0x4b   : > { %s297_s2 = scalar_lea.vmem [#allocation2], %s1490_s10  ;;  %s304_s12 = sadd.s32 %s1622_s17, %s1493_s1 }
  0x4c   : > { %s307_s3 = sshll.u32 %s297_s2, 4  ;;  %s1494_s24 = sshll.u32 %s304_s12, 7  ;;  %s308_s3 = int_to_ptr.vmem [resolvable:$true] %s307_s3 }
  0x4d   : > { %s2363_s14 = scalar_select %p48_p1, %s2151_s26, %s50_s19  }
  0x4e   : > { %p2369_p2 = pnand %p1679_p0, %p2350_p10  ;;  %s306_s15 = scalar_lea.hbm %s2608_s0, %s1494_s24 }
  0x4f   : > { %s294_s22 = scalar_lea.sflag [#allocation3], %s293_s21  ;;  %s1996_s2 = scalar_lea.vmem %s308_s3, 512 }
  0x50   : > { %p1985_p3 = pneg %p2369_p2  ;;  %p1997_p4 = scmp.ne.s32.totalorder %s308_s3, %s1996_s2 }
  0x51   : > { %s2178_s1 = smov [#allocation2]  }
  0x52   : > { %p1999_p6 = pnand %p1997_p4, %p1985_p3  ;;  %s2001_s10 = sshll.u32 %s2178_s1, 4  ;;  %s2002_s10 = int_to_ptr.vmem [resolvable:$false] %s2001_s10 }
  0x53   : > { %s2003_s12 = scalar_lea.vmem %s2002_s10, 1024  ;;  %p2004_p11 = scmp.lt.s32.totalorder %s308_s3, %s2002_s10 }
  0x54   : > { %p2000_p8 = pneg %p1999_p6  ;;  %p2005_p5 = scmp.lt.s32.totalorder %s2003_s12, %s1996_s2 }
  0x56   : > { %p2006_p7 = por %p2005_p5, %p2004_p11 }
  0x58   : > { %p2007_p9 = pnand %p2006_p7, %p2000_p8 }
  0x5a   : > { %2010 = shalt.err (!%p2007_p9)
}
  0x5b   : > { %s2179_s19 = smov 256   ;;  %s2180_s5 = smov 16  }
  0x5c   : > { %1665 = dma.hbm_to_vmem [thread:$0]  (!%p2369_p2), %s306_s15, 512, %s308_s3, %s294_s22, %s2179_s19, %s2179_s19, %s2180_s5  }
  0x5d   : > { %p2646_p12 = scmp.ne.s32.totalorder %s2636_s13, 0 }
  0x5e   : > { %s2383_s24 = sand.u32 (!%p2646_p12), 1, %s2147_s25   ;;  %p2647_p10 = scmp.ne.s32.totalorder (!%p2646_p12), %s2633_s11, 0 }
  0x5f   : > { %319 = sbr.rel (%p2646_p12) target bundleno = 705 (0x2c1), region = 40  ;;  %s1496_s29 = sshll.u32 (!%p2646_p12), %s2383_s24, 5 }
  0x60   : > { %s322_s20 = scalar_lea.sflag (!%p2646_p12), [#allocation3], %s2383_s24  ;;  %s325_s21 = scalar_lea.vmem (!%p2646_p12), [#allocation2], %s1496_s29 }
  0x64   : > { %2122 = dma.done.wait (%p2647_p10), %s322_s20, 512  }
  0x65   : > { %2124 = vsyncadd (%p2647_p10), %s322_s20, 4294966784  ;;  %p2648_p0 = scmp.eq.s32.totalorder %s2267_s9, 0 }
  0x67   : > { %2126 = dma.done.wait (%p2648_p0), [#allocation6], 64   ;;  %p2649_p1 = pmov %p2648_p0 }
  0x68   : > { %p2650_p2 = pmov %p2648_p0 }
  0x69   : > { %2128 = vsyncadd (%p2649_p1), [#allocation6], 4294967232 }
  0x6a   : > { %2130 = dma.done.wait (%p2650_p2), [#allocation9], 12288   ;;  %p2651_p3 = pmov %p2648_p0 }
  0x6b   : > { %v2399_v0 = vld [vmem:[%s325_s21] sm:$0xff]  ;;  %v2401_v1 = vld [vmem:[%s325_s21 + $0x8] sm:$0xff]  ;;  %v2403_v2 = vld [vmem:[%s325_s21 + $0x10] sm:$0xff]  ;;  %s2463_s11 = sshll.u32 %s2383_s24, 4  ;;  %s1629_s13 = sshll.u32 %s2155_s27, 2 }
  0x6c   : > { %2132 = vsyncadd (%p2651_p3), [#allocation9], 4294955008  ;;  %v388_v3 = vadd.f32 %v2401_v1, %v2399_v0  ;;  %v2407_v4 = vld [vmem:[%s325_s21 + $0x18] sm:$0xff]  ;;  %v1759_v7 = vld [vmem:[#allocation8 + $0x150] ss:$24 sps:$4 sm:$0xff]   ;;  %s1610_s17 = sshll.u32 %s2159_s28, 4 }
  0x6d   : > { %v391_v5 = vadd.f32 %v2407_v4, %v2403_v2  ;;  %v1757_v6 = vld [vmem:[#allocation8 + $0x154] ss:$24 sps:$4 sm:$0xff]   ;;  %v1762_v9 = vld [vmem:[#allocation8 + $0x158] ss:$24 sps:$4 sm:$0xff]   ;;  %v1763_v10 = vld [vmem:[#allocation8 + $0x124] ss:$24 sps:$4 sm:$0xff]   ;;  %s1256_s23 = sadd.s32 %s1629_s13, %s1610_s17 }
  0x6e   : > { %389 = vadd.xlane.f32.xlu0 %v388_v3  ;;  %v1760_v8 = vld [vmem:[#allocation8 + $0x15c] ss:$24 sps:$4 sm:$0xff]   ;;  %1061 = vmatprep.subr.bf16.mxu0 %v1757_v6  ;;  %v1766_v11 = vld [vmem:[#allocation8 + $0x12c] ss:$24 sps:$4 sm:$0xff]   ;;  %v1765_v12 = vld [vmem:[#allocation8 + $0x120] ss:$24 sps:$4 sm:$0xff]  }
  0x6f   : > { %1104 = vmatprep.subr.bf16.mxu1 %v1760_v8  ;;  %1062 = vmatpush1.bf16.msra.mxu0 %v1759_v7  ;;  %v1768_v13 = vld [vmem:[#allocation8 + $0x128] ss:$24 sps:$4 sm:$0xff]   ;;  %v1769_v14 = vld [vmem:[#allocation8 + $0xf4] ss:$24 sps:$4 sm:$0xff]   ;;  %v1774_v17 = vld [vmem:[#allocation8 + $0xf8] ss:$24 sps:$4 sm:$0xff]  }
  0x70   : > { %1105 = vmatpush1.bf16.msra.mxu1 %v1762_v9  ;;  %1063 = vmatprep.subr.bf16.mxu0 %v1763_v10  ;;  %v1772_v15 = vld [vmem:[#allocation8 + $0xfc] ss:$24 sps:$4 sm:$0xff]   ;;  %v1771_v16 = vld [vmem:[#allocation8 + $0xf0] ss:$24 sps:$4 sm:$0xff]   ;;  %v1778_v19 = vld [vmem:[#allocation8 + $0xcc] ss:$24 sps:$4 sm:$0xff]  }
  0x71   : > { %1106 = vmatprep.subr.bf16.mxu1 %v1766_v11  ;;  %v1775_v18 = vld [vmem:[#allocation8 + $0xc4] ss:$24 sps:$4 sm:$0xff]   ;;  %v1777_v20 = vld [vmem:[#allocation8 + $0xc0] ss:$24 sps:$4 sm:$0xff]   ;;  %v1781_v22 = vld [vmem:[#allocation8 + $0x94] ss:$24 sps:$4 sm:$0xff]  }
  0x72   : > { %392 = vadd.xlane.f32.xlu0 %v391_v5  ;;  %v1780_v21 = vld [vmem:[#allocation8 + $0xc8] ss:$24 sps:$4 sm:$0xff]   ;;  %v1784_v23 = vld [vmem:[#allocation8 + $0x9c] ss:$24 sps:$4 sm:$0xff]   ;;  %v1786_v25 = vld [vmem:[#allocation8 + $0x98] ss:$24 sps:$4 sm:$0xff]  }
  0x73   : > { %1064 = vmatpush1.bf16.msra.mxu0 %v1765_v12  ;;  %v1783_v24 = vld [vmem:[#allocation8 + $0x90] ss:$24 sps:$4 sm:$0xff]   ;;  %v1787_v26 = vld [vmem:[#allocation8 + $0x64] ss:$24 sps:$4 sm:$0xff]   ;;  %v1789_v28 = vld [vmem:[#allocation8 + $0x60] ss:$24 sps:$4 sm:$0xff]  }
  0x74   : > { %1107 = vmatpush1.bf16.msra.mxu1 %v1768_v13  ;;  %1065 = vmatprep.subr.bf16.mxu0 %v1769_v14  ;;  %v1790_v27 = vld [vmem:[#allocation8 + $0x6c] ss:$24 sps:$4 sm:$0xff]   ;;  %v1792_v29 = vld [vmem:[#allocation8 + $0x68] ss:$24 sps:$4 sm:$0xff]   ;;  %v1796_v31 = vld [vmem:[#allocation8 + $0x3c] ss:$24 sps:$4 sm:$0xff]  }
  0x75   : > { %1108 = vmatprep.subr.bf16.mxu1 %v1772_v15  ;;  %v1793_v30 = vld [vmem:[#allocation8 + $0x34] ss:$24 sps:$4 sm:$0xff]   ;;  %v1795_v32 = vld [vmem:[#allocation8 + $0x30] ss:$24 sps:$4 sm:$0xff]   ;;  %v1799_v34 = vld [vmem:[#allocation8 + $0x4] ss:$24 sps:$4 sm:$0xff]  }
  0x76   : > { %v1798_v33 = vld [vmem:[#allocation8 + $0x38] ss:$24 sps:$4 sm:$0xff]   ;;  %v1802_v35 = vld [vmem:[#allocation8 + $0xc] ss:$24 sps:$4 sm:$0xff]   ;;  %v1804_v37 = vld [vmem:[#allocation8 + $0x8] ss:$24 sps:$4 sm:$0xff]  }
  0x77   : > { %1066 = vmatpush1.bf16.msra.mxu0 %v1771_v16  ;;  %v1801_v36 = vld [vmem:[#allocation8] ss:$24 sps:$4 sm:$0xff]   ;;  %v1805_v38 = vld [vmem:[#allocation8 + $0x2d4] ss:$24 sps:$4 sm:$0xff]   ;;  %v1807_v40 = vld [vmem:[#allocation8 + $0x2d0] ss:$24 sps:$4 sm:$0xff]  }
  0x78   : > { %1109 = vmatpush1.bf16.msra.mxu1 %v1774_v17  ;;  %1067 = vmatprep.subr.bf16.mxu0 %v1775_v18  ;;  %v1808_v39 = vld [vmem:[#allocation8 + $0x2dc] ss:$24 sps:$4 sm:$0xff]   ;;  %v1810_v55 = vld [vmem:[#allocation8 + $0x2d8] ss:$24 sps:$4 sm:$0xff]   ;;  %v1814_v58 = vld [vmem:[#allocation8 + $0x2ac] ss:$24 sps:$4 sm:$0xff]  }
  0x79   : > { %1110 = vmatprep.subr.bf16.mxu1 %v1778_v19  ;;  %v1811_v56 = vld [vmem:[#allocation8 + $0x2a4] ss:$24 sps:$4 sm:$0xff]   ;;  %v1813_v57 = vld [vmem:[#allocation8 + $0x2a0] ss:$24 sps:$4 sm:$0xff]   ;;  %v1817_v60 = vld [vmem:[#allocation8 + $0x274] ss:$24 sps:$4 sm:$0xff]  }
  0x7a   : > { %v1816_v59 = vld [vmem:[#allocation8 + $0x2a8] ss:$24 sps:$4 sm:$0xff]   ;;  %v1820_v62 = vld [vmem:[#allocation8 + $0x27c] ss:$24 sps:$4 sm:$0xff]   ;;  %v1822_v63 = vld [vmem:[#allocation8 + $0x278] ss:$24 sps:$4 sm:$0xff]  }
  0x7b   : > { %1068 = vmatpush1.bf16.msra.mxu0 %v1777_v20  ;;  %v1819_v61 = vld [vmem:[#allocation8 + $0x270] ss:$24 sps:$4 sm:$0xff]   ;;  %v1832_v5 = vld [vmem:[#allocation8 + $0x21c] ss:$24 sps:$4 sm:$0xff]   ;;  %v1838_v9 = vld [vmem:[#allocation8 + $0x1ec] ss:$24 sps:$4 sm:$0xff]  }
  0x7c   : > { %1111 = vmatpush1.bf16.msra.mxu1 %v1780_v21  ;;  %1069 = vmatprep.subr.bf16.mxu0 %v1781_v22  ;;  %v1828_v3 = vld [vmem:[#allocation8 + $0x248] ss:$24 sps:$4 sm:$0xff]   ;;  %v1834_v7 = vld [vmem:[#allocation8 + $0x218] ss:$24 sps:$4 sm:$0xff]   ;;  %v1835_v8 = vld [vmem:[#allocation8 + $0x1e4] ss:$24 sps:$4 sm:$0xff]  }
  0x7d   : > { %1112 = vmatprep.subr.bf16.mxu1 %v1784_v23  ;;  %v1831_v6 = vld [vmem:[#allocation8 + $0x210] ss:$24 sps:$4 sm:$0xff]   ;;  %v1837_v10 = vld [vmem:[#allocation8 + $0x1e0] ss:$24 sps:$4 sm:$0xff]   ;;  %v1841_v12 = vld [vmem:[#allocation8 + $0x1b4] ss:$24 sps:$4 sm:$0xff]  }
  0x7e   : > { %v1840_v11 = vld [vmem:[#allocation8 + $0x1e8] ss:$24 sps:$4 sm:$0xff]   ;;  %v1844_v13 = vld [vmem:[#allocation8 + $0x1bc] ss:$24 sps:$4 sm:$0xff]   ;;  %v1846_v15 = vld [vmem:[#allocation8 + $0x1b8] ss:$24 sps:$4 sm:$0xff]  }
  0x7f   : > { %1070 = vmatpush1.bf16.msra.mxu0 %v1783_v24  ;;  %v1843_v14 = vld [vmem:[#allocation8 + $0x1b0] ss:$24 sps:$4 sm:$0xff]   ;;  %v1847_v16 = vld [vmem:[#allocation8 + $0x184] ss:$24 sps:$4 sm:$0xff]   ;;  %v1849_v18 = vld [vmem:[#allocation8 + $0x180] ss:$24 sps:$4 sm:$0xff]  }
  0x80   : > { %1113 = vmatpush1.bf16.msra.mxu1 %v1786_v25  ;;  %1071 = vmatprep.subr.bf16.mxu0 %v1787_v26  ;;  %v1850_v17 = vld [vmem:[#allocation8 + $0x18c] ss:$24 sps:$4 sm:$0xff]   ;;  %v1852_v19 = vld [vmem:[#allocation8 + $0x188] ss:$24 sps:$4 sm:$0xff]   ;;  %s363_s15 = scalar_lea.vmem [#allocation10], %s2463_s11  ;;  %s370_s2 = scalar_lea.vmem [#allocation11], %s2463_s11 }
  0x81   : > { %1114 = vmatprep.subr.bf16.mxu1 %v1790_v27  ;;  %v1855_v20 = vld [vmem:[#allocation8 + $0x164] ss:$24 sps:$4 sm:$0xff]   ;;  %v422_v27 = vlaneseq  ;;  %s1259_s22 = sshll.u32 %s363_s15, 4  ;;  %s1278_s1 = sshll.u32 %s370_s2, 4  ;;  %s2475_s22 = int_to_ptr.vmem [resolvable:$true] %s1259_s22  ;;  %s2477_s1 = int_to_ptr.vmem [resolvable:$true] %s1278_s1 }
  0x82   : > { %s1237_s10 = sand.u32 1, %s2267_s9   ;;  %s2473_s27 = sshll.u32 %s1256_s23, 6 }
  0x83   : > { %1072 = vmatpush1.bf16.msra.mxu0 %v1789_v28  ;;  %v2431_v28 = vshrl.u32 %v422_v27, 7  ;;  %s2483_s12 = scalar_lea.hbm %s2614_s6, %s2473_s27  ;;  %s2652_s29 = sld [smem:[#allocation26_spill]] }
  0x84   : > { %1115 = vmatpush1.bf16.msra.mxu1 %v1792_v29  ;;  %1073 = vmatprep.subr.bf16.mxu0 %v1793_v30  ;;  %s2491_s3 = scalar_lea.sflag [#allocation12], %s1237_s10  ;;  %s2011_s7 = scalar_lea.vmem %s2477_s1, 256 }
  0x85   : > { %1116 = vmatprep.subr.bf16.mxu1 %v1796_v31  ;;  %v2434_v29 = vsub.s32 1, %v2431_v28  ;;  %v2437_v30 = vsub.s32 0, %v2431_v28  ;;  %v386_v31 = vld [vmem:[#allocation5] sm:$0x3]  ;;  %p2012_p4 = scmp.ne.s32.totalorder %s2477_s1, %s2011_s7  ;;  %s2181_s13 = smov [#allocation11]  }
  0x86   : > { %s2015_s17 = sshll.u32 %s2181_s13, 4  ;;  %s2016_s17 = int_to_ptr.vmem [resolvable:$false] %s2015_s17 }
  0x87   : > { %1074 = vmatpush1.bf16.msra.mxu0 %v1795_v32  ;;  %p2013_p6 = pnand %p2012_p4, %p2346_p13  ;;  %s2017_s23 = scalar_lea.vmem %s2016_s17, 512 }
  0x88   : > { %1117 = vmatpush1.bf16.msra.mxu1 %v1798_v33  ;;  %1075 = vmatprep.subr.bf16.mxu0 %v1799_v34  ;;  %v387_v33 = vld [vmem:[#allocation7] sm:$0x3]  ;;  %p2018_p11 = scmp.lt.s32.totalorder %s2477_s1, %s2016_s17  ;;  %p2019_p5 = scmp.lt.s32.totalorder %s2017_s23, %s2011_s7 }
  0x89   : > { %1118 = vmatprep.subr.bf16.mxu1 %v1802_v35  ;;  %v429_v35 = vrot.slane %v386_v31, %v2434_v29  ;;  %s2653_s20 = smov %s2652_s29  ;;  %s2489_s21 = scalar_lea.hbm %s2652_s29, %s2473_s27 }
  0x8a   : > { %p2014_p8 = pneg %p2013_p6  ;;  %p2020_p7 = por %p2019_p5, %p2018_p11 }
  0x8b   : > { %1076 = vmatpush1.bf16.msra.mxu0 %v1801_v36 }
  0x8c   : > { %1119 = vmatpush1.bf16.msra.mxu1 %v1804_v37  ;;  %1077 = vmatprep.subr.bf16.mxu0 %v1805_v38  ;;  %v425_v37 = vrot.slane %v386_v31, %v2437_v30  ;;  %p2021_p9 = pnand %p2020_p7, %p2014_p8 }
  0x8d   : > { %1120 = vmatprep.subr.bf16.mxu1 %v1808_v39  ;;  %v444_v39 = vrot.slane %v387_v33, %v2434_v29 }
  0x8f   : > { %1078 = vmatpush2.bf16.msra.mxu0 %v1807_v40  ;;  %v440_v40 = vrot.slane %v387_v33, %v2437_v30 }
  0x90   : > { %1121 = vmatpush2.bf16.msra.mxu1 %v1810_v55  ;;  %1079 = vmatprep.subr.bf16.mxu0 %v1811_v56  ;;  %v1858_v56 = vld [vmem:[#allocation8 + $0x134] ss:$24 sps:$4 sm:$0xff]  }
  0x91   : > { %1122 = vmatprep.subr.bf16.mxu1 %v1814_v58  ;;  %v1864_v58 = vld [vmem:[#allocation8 + $0xd4] ss:$24 sps:$4 sm:$0xff]  }
  0x93   : > { %1080 = vmatpush2.bf16.msra.mxu0 %v1813_v57  ;;  %v1859_v57 = vld [vmem:[#allocation8 + $0x100] ss:$24 sps:$4 sm:$0xff]  }
  0x94   : > { %1123 = vmatpush2.bf16.msra.mxu1 %v1816_v59  ;;  %1081 = vmatprep.subr.bf16.mxu0 %v1817_v60  ;;  %v1862_v59 = vld [vmem:[#allocation8 + $0xd0] ss:$24 sps:$4 sm:$0xff]   ;;  %v1867_v60 = vld [vmem:[#allocation8 + $0xa4] ss:$24 sps:$4 sm:$0xff]  }
  0x95   : > { %1124 = vmatprep.subr.bf16.mxu1 %v1820_v62  ;;  %v1870_v62 = vld [vmem:[#allocation8 + $0x74] ss:$24 sps:$4 sm:$0xff]  }
  0x97   : > { %1082 = vmatpush2.bf16.msra.mxu0 %v1819_v61  ;;  %v1865_v61 = vld [vmem:[#allocation8 + $0xa0] ss:$24 sps:$4 sm:$0xff]  }
  0x98   : > { %1125 = vmatpush2.bf16.msra.mxu1 %v1822_v63  ;;  %v1868_v63 = vld [vmem:[#allocation8 + $0x70] ss:$24 sps:$4 sm:$0xff]  }
  0xf7   : > { %v390_v41 = vpop.xlane.xlu0 %389 }
  0xf8   : > { %v395_v42 = vmul.f32 0.00390625, %v390_v41 }
  0xfa   : > { %v2412_v43 = vsub.f32 %v2399_v0, %v395_v42  ;;  %v2415_v44 = vsub.f32 %v2401_v1, %v395_v42  ;;  %v1823_v0 = vld [vmem:[#allocation8 + $0x244] ss:$24 sps:$4 sm:$0xff]   ;;  %v1825_v1 = vld [vmem:[#allocation8 + $0x240] ss:$24 sps:$4 sm:$0xff]  }
  0xfb   : > { %v393_v45 = vpop.xlane.xlu0 %392  ;;  %1083 = vmatprep.subr.bf16.mxu0 %v1823_v0  ;;  %v1873_v0 = vld [vmem:[#allocation8 + $0x44] ss:$24 sps:$4 sm:$0xff]  }
  0xfc   : > { %v396_v46 = vmul.f32 0.00390625, %v393_v45  ;;  %v401_v47 = vmul.f32 %v2412_v43, %v2412_v43  ;;  %v402_v48 = vmul.f32 %v2415_v44, %v2415_v44  ;;  %1084 = vmatpush2.bf16.msra.mxu0 %v1825_v1  ;;  %v1871_v1 = vld [vmem:[#allocation8 + $0x40] ss:$24 sps:$4 sm:$0xff]  }
  0xfe   : > { %v2422_v49 = vsub.f32 %v2403_v2, %v396_v46  ;;  %v2425_v50 = vsub.f32 %v2407_v4, %v396_v46  ;;  %v405_v51 = vadd.f32 %v402_v48, %v401_v47  ;;  %v1826_v2 = vld [vmem:[#allocation8 + $0x24c] ss:$24 sps:$4 sm:$0xff]  }
  0xff   : > { %v1829_v4 = vld [vmem:[#allocation8 + $0x214] ss:$24 sps:$4 sm:$0xff]   ;;  %1126 = vmatprep.subr.bf16.mxu1 %v1826_v2 }
 0x100   : > { %406 = vadd.xlane.f32.xlu1 %v405_v51  ;;  %v403_v52 = vmul.f32 %v2422_v49, %v2422_v49  ;;  %v404_v53 = vmul.f32 %v2425_v50, %v2425_v50  ;;  %1127 = vmatpush2.bf16.msra.mxu1 %v1828_v3  ;;  %v1876_v2 = vld [vmem:[#allocation8 + $0x14] ss:$24 sps:$4 sm:$0xff]   ;;  %v1874_v3 = vld [vmem:[#allocation8 + $0x10] ss:$24 sps:$4 sm:$0xff]  }
 0x101   : > { %1085 = vmatprep.subr.bf16.mxu0 %v1829_v4  ;;  %1128 = vmatprep.subr.bf16.mxu1 %v1832_v5  ;;  %v1879_v4 = vld [vmem:[#allocation8 + $0x2e4] ss:$24 sps:$4 sm:$0xff]   ;;  %v1877_v5 = vld [vmem:[#allocation8 + $0x2e0] ss:$24 sps:$4 sm:$0xff]  }
 0x102   : > { %v408_v54 = vadd.f32 %v404_v53, %v403_v52  ;;  %1086 = vmatpush2.bf16.msra.mxu0 %v1831_v6  ;;  %v1882_v6 = vld [vmem:[#allocation8 + $0x2b4] ss:$24 sps:$4 sm:$0xff]  }
 0x103   : > { %1087 = vmatprep.subr.bf16.mxu0 %v1835_v8  ;;  %v1885_v8 = vld [vmem:[#allocation8 + $0x284] ss:$24 sps:$4 sm:$0xff]  }
 0x104   : > { %409 = vadd.xlane.f32.xlu1 %v408_v54  ;;  %1129 = vmatpush2.bf16.msra.mxu1 %v1834_v7  ;;  %v1853_v54 = vld [vmem:[#allocation8 + $0x160] ss:$24 sps:$4 sm:$0xff]   ;;  %v1880_v7 = vld [vmem:[#allocation8 + $0x2b0] ss:$24 sps:$4 sm:$0xff]  }
 0x105   : > { %1130 = vmatprep.subr.bf16.mxu1 %v1838_v9  ;;  %v1883_v9 = vld [vmem:[#allocation8 + $0x280] ss:$24 sps:$4 sm:$0xff]  }
 0x106   : > { %1088 = vmatpush2.bf16.msra.mxu0 %v1837_v10  ;;  %v1888_v10 = vld [vmem:[#allocation8 + $0x254] ss:$24 sps:$4 sm:$0xff]  }
 0x107   : > { %1089 = vmatprep.subr.bf16.mxu0 %v1841_v12  ;;  %v1891_v12 = vld [vmem:[#allocation8 + $0x224] ss:$24 sps:$4 sm:$0xff]  }
 0x108   : > { %1131 = vmatpush2.bf16.msra.mxu1 %v1840_v11  ;;  %v1886_v11 = vld [vmem:[#allocation8 + $0x250] ss:$24 sps:$4 sm:$0xff]  }
 0x109   : > { %1132 = vmatprep.subr.bf16.mxu1 %v1844_v13  ;;  %v1889_v13 = vld [vmem:[#allocation8 + $0x220] ss:$24 sps:$4 sm:$0xff]  }
 0x10a   : > { %1090 = vmatpush2.bf16.msra.mxu0 %v1843_v14  ;;  %v1894_v14 = vld [vmem:[#allocation8 + $0x1f4] ss:$24 sps:$4 sm:$0xff]  }
 0x10b   : > { %1091 = vmatprep.subr.bf16.mxu0 %v1847_v16  ;;  %v1897_v16 = vld [vmem:[#allocation8 + $0x1c4] ss:$24 sps:$4 sm:$0xff]  }
 0x10c   : > { %1133 = vmatpush2.bf16.msra.mxu1 %v1846_v15  ;;  %v1892_v15 = vld [vmem:[#allocation8 + $0x1f0] ss:$24 sps:$4 sm:$0xff]  }
 0x10d   : > { %1134 = vmatprep.subr.bf16.mxu1 %v1850_v17  ;;  %v1895_v17 = vld [vmem:[#allocation8 + $0x1c0] ss:$24 sps:$4 sm:$0xff]  }
 0x10e   : > { %1092 = vmatpush2.bf16.msra.mxu0 %v1849_v18  ;;  %v1900_v18 = vld [vmem:[#allocation8 + $0x194] ss:$24 sps:$4 sm:$0xff]  }
 0x10f   : > { %1147 = vmatprep.subr.bf16.mxu0 %v1855_v20  ;;  %v561_v20 = vsub.s32 2, %v2431_v28 }
 0x110   : > { %1135 = vmatpush2.bf16.msra.mxu1 %v1852_v19  ;;  %v1898_v19 = vld [vmem:[#allocation8 + $0x190] ss:$24 sps:$4 sm:$0xff]  }
 0x189   : > { %v407_v21 = vpop.xlane.xlu1 %406 }
 0x18a   : > { %v411_v22 = vmul.f32 0.00390625, %v407_v21  ;;  %v565_v21 = vsub.s32 3, %v2431_v28 }
 0x18c   : > { %v413_v23 = vadd.f32 1e-05, %v411_v22  ;;  %v2457_v22 = vld [vmem:[%s2612_s4] sm:$0x3f] }
 0x18d   : > { %v410_v24 = vpop.xlane.xlu1 %409 }
 0x18e   : > { %1901 = vrsqrt.f32 %v413_v23  ;;  %v412_v25 = vmul.f32 0.00390625, %v410_v24  ;;  %v554_v23 = vrot.slane %v2457_v22, %v2437_v30  ;;  %v562_v24 = vrot.slane %v2457_v22, %v561_v20 }
 0x190   : > { %v414_v26 = vadd.f32 1e-05, %v412_v25  ;;  %v558_v25 = vrot.slane %v2457_v22, %v2434_v29 }
 0x192   : > { %1903 = vrsqrt.f32 %v414_v26  ;;  %v566_v26 = vrot.slane %v2457_v22, %v565_v21 }
 0x19b   : > { %v1902_v32 = vpop.eup %1901 }
 0x19c   : > { %v418_v34 = vmul.f32 %v1902_v32, %v2415_v44  ;;  %v417_v36 = vmul.f32 %v1902_v32, %v2412_v43 }
 0x19e   : > { %v433_v42 = vmul.f32 %v429_v35, %v418_v34  ;;  %v432_v46 = vmul.f32 %v425_v37, %v417_v36 }
 0x19f   : > { %v1904_v38 = vpop.eup %1903 }
 0x1a0   : > { %v420_v41 = vmul.f32 %v1904_v38, %v2425_v50  ;;  %v419_v45 = vmul.f32 %v1904_v38, %v2422_v49  ;;  %v448_v44 = vadd.f32 %v444_v39, %v433_v42  ;;  %v447_v52 = vadd.f32 %v440_v40, %v432_v46  ;;  %v1856_v49 = vld [vmem:[#allocation8 + $0x130] ss:$24 sps:$4 sm:$0xff]   ;;  %v1861_v50 = vld [vmem:[#allocation8 + $0x104] ss:$24 sps:$4 sm:$0xff]  }
 0x1a2   : > { %v435_v47 = vmul.f32 %v429_v35, %v420_v41  ;;  %v434_v48 = vmul.f32 %v425_v37, %v419_v45 }
 0x1a4   : > { %v450_v51 = vadd.f32 %v444_v39, %v435_v47  ;;  %v449_v53 = vadd.f32 %v440_v40, %v434_v48 }
 0x1a6   : > { %v452_v43 = vpack.c.bf16 %v450_v51, %v448_v44  ;;  %v2447_v55 = vpack.c.bf16 %v449_v53, %v447_v52 }
 0x1a8   : > { %1093 = vmatprep.mubr.bf16.mxu0 %v452_v43  ;;  %1136 = vmatprep.mubr.bf16.mxu1 %v452_v43 }
 0x1a9   : > { %1094 = vmatmul.mubr.bf16.vlgmr.msra.gmra.mxu0 %v2447_v55  ;;  %1137 = vmatmul.mubr.bf16.vlgmr.msra.gmra.mxu1 %v2447_v55 }
 0x1aa   : > { %1148 = vmatpush1.bf16.msra.mxu0 %v1853_v54  ;;  %1179 = vmatprep.mubr.bf16.mxu0 %v452_v43 }
 0x1ab   : > { %1149 = vmatprep.subr.bf16.mxu0 %v1858_v56 }
 0x1ae   : > { %1150 = vmatpush1.bf16.msra.mxu0 %v1856_v49 }
 0x1af   : > { %1151 = vmatprep.subr.bf16.mxu0 %v1861_v50 }
 0x1b2   : > { %1152 = vmatpush1.bf16.msra.mxu0 %v1859_v57 }
 0x1b3   : > { %1153 = vmatprep.subr.bf16.mxu0 %v1864_v58 }
 0x1b6   : > { %1154 = vmatpush1.bf16.msra.mxu0 %v1862_v59 }
 0x1b7   : > { %1155 = vmatprep.subr.bf16.mxu0 %v1867_v60 }
 0x1ba   : > { %1156 = vmatpush1.bf16.msra.mxu0 %v1865_v61 }
 0x1bb   : > { %1157 = vmatprep.subr.bf16.mxu0 %v1870_v62 }
 0x1be   : > { %1158 = vmatpush1.bf16.msra.mxu0 %v1868_v63 }
 0x1bf   : > { %1159 = vmatprep.subr.bf16.mxu0 %v1873_v0 }
 0x1c2   : > { %1160 = vmatpush1.bf16.msra.mxu0 %v1871_v1 }
 0x1c3   : > { %1161 = vmatprep.subr.bf16.mxu0 %v1876_v2 }
 0x1c6   : > { %1162 = vmatpush1.bf16.msra.mxu0 %v1874_v3 }
 0x1c7   : > { %1163 = vmatprep.subr.bf16.mxu0 %v1879_v4 }
 0x1ca   : > { %1164 = vmatpush2.bf16.msra.mxu0 %v1877_v5 }
 0x1cb   : > { %1165 = vmatprep.subr.bf16.mxu0 %v1882_v6 }
 0x1ce   : > { %1166 = vmatpush2.bf16.msra.mxu0 %v1880_v7 }
 0x1cf   : > { %1167 = vmatprep.subr.bf16.mxu0 %v1885_v8 }
 0x1d2   : > { %1168 = vmatpush2.bf16.msra.mxu0 %v1883_v9 }
 0x1d3   : > { %1169 = vmatprep.subr.bf16.mxu0 %v1888_v10 }
 0x1d6   : > { %1170 = vmatpush2.bf16.msra.mxu0 %v1886_v11 }
 0x1d7   : > { %1171 = vmatprep.subr.bf16.mxu0 %v1891_v12 }
 0x1da   : > { %1172 = vmatpush2.bf16.msra.mxu0 %v1889_v13 }
 0x1db   : > { %1173 = vmatprep.subr.bf16.mxu0 %v1894_v14 }
 0x1de   : > { %1174 = vmatpush2.bf16.msra.mxu0 %v1892_v15 }
 0x1df   : > { %1175 = vmatprep.subr.bf16.mxu0 %v1897_v16 }
 0x1e2   : > { %1176 = vmatpush2.bf16.msra.mxu0 %v1895_v17 }
 0x1e3   : > { %1177 = vmatprep.subr.bf16.mxu0 %v1900_v18 }
 0x1e6   : > { %1178 = vmatpush2.bf16.msra.mxu0 %v1898_v19 }
 0x1e9   : > { %1180 = vmatmul.mubr.bf16.vlgmr.msra.gmra.mxu0 %v2447_v55 }
 0x269   : > { %v1095_v27 = vpop.f32.mrf.mxu0  ;;  %v1138_v31 = vpop.f32.mrf.mxu1 }
 0x26a   : > { %v1096_v34 = vadd.f32 %v1095_v27, %v554_v23  ;;  %v1139_v30 = vadd.f32 %v1138_v31, %v562_v24 }
 0x26b   : > { %v1097_v32 = vpop.f32.mrf.mxu0  ;;  %v1140_v33 = vpop.f32.mrf.mxu1 }
 0x26c   : > { %v1098_v35 = vadd.f32 %v1097_v32, %v558_v25  ;;  %v1141_v36 = vadd.f32 %v1140_v33, %v566_v26 }
 0x26d   : > { %v1099_v37 = vpop.f32.mrf.mxu0  ;;  %v1142_v29 = vpop.f32.mrf.mxu1 }
 0x26e   : > { %v1623_v38 = vpack.c.bf16 %v1098_v35, %v1096_v34  ;;  %v1625_v39 = vpack.c.bf16 %v1141_v36, %v1139_v30  ;;  %v1100_v42 = vadd.f32 %v1099_v37, %v554_v23  ;;  %v1143_v45 = vadd.f32 %v1142_v29, %v562_v24 }
 0x26f   : > { %v1101_v40 = vpop.f32.mrf.mxu0  ;;  %v1144_v41 = vpop.f32.mrf.mxu1 }
 0x270   : > { %1202 = vst [vmem:[%s363_s15] sm:$0xff] %v1623_v38  ;;  %1216 = vst [vmem:[%s370_s2] sm:$0xff] %v1625_v39  ;;  %v1102_v46 = vadd.f32 %v1101_v40, %v558_v25  ;;  %v1145_v47 = vadd.f32 %v1144_v41, %v566_v26 }
 0x272   : > { %v1624_v48 = vpack.c.bf16 %v1102_v46, %v1100_v42  ;;  %v1626_v44 = vpack.c.bf16 %v1145_v47, %v1143_v45 }
 0x274   : > { %1203 = vst [vmem:[%s363_s15 + $0x8] sm:$0xff] %v1624_v48  ;;  %1217 = vst [vmem:[%s370_s2 + $0x8] sm:$0xff] %v1626_v44 }
 0x275   : > { %2024 = shalt.err (!%p2021_p9)
}
 0x276   : > { %s2025_s15 = scalar_lea.hbm %s2483_s12, 256  ;;  %s2029_s28 = scalar_lea.hbm %s2614_s6, 2048 }
 0x277   : > { %p2026_p12 = scmp.ne.s32.totalorder %s2483_s12, %s2025_s15  ;;  %p2030_p1 = scmp.lt.s32.totalorder %s2483_s12, %s2614_s6 }
 0x278   : > { %p2031_p2 = scmp.lt.s32.totalorder %s2029_s28, %s2025_s15 }
 0x279   : > { %p2027_p10 = pnand %p2026_p12, %p2346_p13 }
 0x27a   : > { %p2032_p3 = por %p2031_p2, %p2030_p1 }
 0x27b   : > { %p2028_p0 = pneg %p2027_p10 }
 0x27d   : > { %p2033_p4 = pnand %p2032_p3, %p2028_p0 }
 0x27f   : > { %2036 = shalt.err (!%p2033_p4)
}
 0x280   : > { %s2182_s5 = smov 128   ;;  %s2183_s29 = smov 8  }
 0x281   : > { %1647 = dma.vmem_to_hbm [thread:$0]  (%p2346_p13), %s2477_s1, 256, %s2483_s12, %s2491_s3, %s2182_s5, %s2182_s5, %s2183_s29  }
 0x282   : > { %s1233_s7 = scalar_lea.sflag [#allocation4], %s2383_s24  ;;  %s2037_s13 = scalar_lea.vmem %s2475_s22, 256 }
 0x283   : > { %p2038_p6 = scmp.ne.s32.totalorder %s2475_s22, %s2037_s13  ;;  %s2184_s17 = smov [#allocation10]  }
 0x284   : > { %s2041_s23 = sshll.u32 %s2184_s17, 4  ;;  %s2042_s23 = int_to_ptr.vmem [resolvable:$false] %s2041_s23 }
 0x285   : > { %p2039_p8 = pnand %p2038_p6, %p2346_p13  ;;  %s2043_s15 = scalar_lea.vmem %s2042_s23, 512 }
 0x286   : > { %p2044_p5 = scmp.lt.s32.totalorder %s2475_s22, %s2042_s23  ;;  %p2045_p7 = scmp.lt.s32.totalorder %s2043_s15, %s2037_s13 }
 0x287   : > { %p2040_p11 = pneg %p2039_p8 }
 0x288   : > { %p2046_p9 = por %p2045_p7, %p2044_p5 }
 0x28a   : > { %p2047_p12 = pnand %p2046_p9, %p2040_p11 }
 0x28c   : > { %2050 = shalt.err (!%p2047_p12)
}
 0x28d   : > { %s2051_s1 = scalar_lea.hbm %s2489_s21, 256  ;;  %s2055_s2 = scalar_lea.hbm %s2653_s20, 2048 }
 0x28e   : > { %p2052_p10 = scmp.ne.s32.totalorder %s2489_s21, %s2051_s1  ;;  %p2056_p2 = scmp.lt.s32.totalorder %s2489_s21, %s2653_s20 }
 0x28f   : > { %p2057_p3 = scmp.lt.s32.totalorder %s2055_s2, %s2051_s1 }
 0x290   : > { %p2053_p0 = pnand %p2052_p10, %p2346_p13 }
 0x291   : > { %p2058_p4 = por %p2057_p3, %p2056_p2 }
 0x292   : > { %p2054_p1 = pneg %p2053_p0 }
 0x294   : > { %p2059_p6 = pnand %p2058_p4, %p2054_p1 }
 0x296   : > { %2062 = shalt.err (!%p2059_p6)
}
 0x297   : > { %1646 = dma.vmem_to_hbm [thread:$0]  (%p2346_p13), %s2475_s22, 256, %s2489_s21, %s1233_s7, %s2182_s5, %s2182_s5, %s2183_s29   ;;  %v569_v51 = vsub.s32 4, %v2431_v28  ;;  %v573_v52 = vsub.s32 5, %v2431_v28 }
 0x298   : > { %s377_s9 = scalar_lea.vmem [#allocation13], %s2463_s11  ;;  %s2654_s7 = sld [smem:[#allocation27_spill]] }
 0x299   : > { %v570_v53 = vrot.slane %v2457_v22, %v569_v51  ;;  %v574_v43 = vrot.slane %v2457_v22, %v573_v52  ;;  %s1297_s19 = sshll.u32 %s377_s9, 4  ;;  %s2185_s11 = smov [#allocation13]   ;;  %s2546_s19 = int_to_ptr.vmem [resolvable:$true] %s1297_s19 }
 0x29a   : > { %s2063_s17 = scalar_lea.vmem %s2546_s19, 256  ;;  %s2067_s23 = sshll.u32 %s2185_s11, 4  ;;  %s2068_s23 = int_to_ptr.vmem [resolvable:$false] %s2067_s23 }
 0x29b   : > { %p2064_p8 = scmp.ne.s32.totalorder %s2546_s19, %s2063_s17  ;;  %s2069_s15 = scalar_lea.vmem %s2068_s23, 512 }
 0x29c   : > { %p2070_p7 = scmp.lt.s32.totalorder %s2546_s19, %s2068_s23  ;;  %p2071_p9 = scmp.lt.s32.totalorder %s2069_s15, %s2063_s17 }
 0x29d   : > { %p2065_p11 = pnand %p2064_p8, %p2346_p13 }
 0x29e   : > { %s2552_s13 = scalar_lea.hbm %s2654_s7, %s2473_s27  ;;  %p2072_p12 = por %p2071_p9, %p2070_p7 }
 0x29f   : > { %p2066_p5 = pneg %p2065_p11 }
 0x2a1   : > { %p2073_p10 = pnand %p2072_p12, %p2066_p5 }
 0x2a9   : > { %v1181_v54 = vpop.f32.mrf.mxu0 }
 0x2aa   : > { %v1182_v56 = vadd.f32 %v1181_v54, %v570_v53 }
 0x2ab   : > { %v1183_v55 = vpop.f32.mrf.mxu0 }
 0x2ac   : > { %v1184_v49 = vadd.f32 %v1183_v55, %v574_v43 }
 0x2ad   : > { %v1185_v50 = vpop.f32.mrf.mxu0 }
 0x2ae   : > { %v1627_v57 = vpack.c.bf16 %v1184_v49, %v1182_v56  ;;  %v1186_v59 = vadd.f32 %v1185_v50, %v570_v53 }
 0x2af   : > { %v1187_v58 = vpop.f32.mrf.mxu0 }
 0x2b0   : > { %1230 = vst [vmem:[%s377_s9] sm:$0xff] %v1627_v57  ;;  %v1188_v60 = vadd.f32 %v1187_v58, %v574_v43 }
 0x2b2   : > { %v1628_v28 = vpack.c.bf16 %v1188_v60, %v1186_v59 }
 0x2b4   : > { %1231 = vst [vmem:[%s377_s9 + $0x8] sm:$0xff] %v1628_v28 }
 0x2b5   : > { %2076 = shalt.err (!%p2073_p10)
}
 0x2b6   : > { %s2077_s27 = scalar_lea.hbm %s2552_s13, 256  ;;  %s2081_s12 = scalar_lea.hbm %s2654_s7, 2048 }
 0x2b7   : > { %p2078_p0 = scmp.ne.s32.totalorder %s2552_s13, %s2077_s27  ;;  %p2082_p3 = scmp.lt.s32.totalorder %s2552_s13, %s2654_s7 }
 0x2b8   : > { %p2083_p4 = scmp.lt.s32.totalorder %s2081_s12, %s2077_s27 }
 0x2b9   : > { %p2079_p1 = pnand %p2078_p0, %p2346_p13 }
 0x2ba   : > { %p2084_p6 = por %p2083_p4, %p2082_p3 }
 0x2bb   : > { %p2080_p2 = pneg %p2079_p1 }
 0x2bd   : > { %p2085_p8 = pnand %p2084_p6, %p2080_p2 }
 0x2bf   : > { %2088 = shalt.err (!%p2085_p8)
}
 0x2c0   : > { %1648 = dma.vmem_to_hbm [thread:$0]  (%p2346_p13), %s2546_s19, 256, %s2552_s13, %s2491_s3, %s2182_s5, %s2182_s5, %s2183_s29  }
 0x2c1 PF: > { %s2655_s28 = sld [smem:[#allocation19_spill]]  ;;  %p1683_p11 = scmp.ge.s32.totalorder %s2171_s8, 2 }
 0x2c2   : > { %s2656_s9 = sld [smem:[#allocation21_spill]] }
 0x2c7   : > { %s1312_s22 = sand.u32 1, %s2655_s28  }
 0x2c8   : > { %p2657_p5 = scmp.ne.s32.totalorder %s2656_s9, 0  ;;  %s1313_s21 = scalar_lea.sflag [#allocation4], %s1312_s22 }
 0x2ca   : > { %p1667_p7 = pnand %p1683_p11, %p2657_p5 }
 0x2cc   : > { %p1668_p9 = pneg %p1667_p7 }
 0x2ce   : > { %2134 = dma.done.wait (%p1668_p9), %s1313_s21, 256  }
 0x2cf   : > { %2136 = vsyncadd (%p1668_p9), %s1313_s21, 4294967040  ;;  %s2658_s18 = sadd.s32 4294967294, %s2171_s8  }
 0x2d0   : > { %s1321_s17 = sand.u32 1, %s2658_s18  }
 0x2d1   : > { %s1322_s11 = scalar_lea.sflag [#allocation12], %s1321_s17 }
 0x2d2   : > { %2138 = dma.done.wait (%p1668_p9), %s1322_s11, 512  }
 0x2d3   : > { %2140 = vsyncadd (%p1668_p9), %s1322_s11, 4294966784  ;;  %s29_s8 = sadd.s32 1, %s2171_s8   ;;  %s2659_s27 = sld [smem:[#allocation20_spill]] }
 0x2d4   : > { %p26_p13 = scmp.ge.s32.totalorder %s29_s8, 10   ;;  %s2660_s29 = sld [smem:[#allocation22_spill]] }
 0x2d5   : > { %s2661_s24 = smov %s2147_s25  ;;  %s2662_s25 = smov %s2151_s26 }
 0x2d6   : > { %s2663_s26 = smov %s2363_s14  ;;  %s2664_s28 = smov %s2167_s30 }
 0x2d7   : > { %s2665_s30 = smov %s2671_s16  ;;  %28 = sbr.rel (!%p26_p13) target bundleno = 17 (0x11), region = 129 }
 0x2dc   :  { %1336 = vsyncpa [#allocation3], 1 }
 0x2dd   :  { %1338 = vsyncpa [#allocation3 + $0x1], 1 }
 0x2de   :  { %1339 = vsyncpa [#allocation6], 1 }
 0x2df   :  { %1340 = vsyncpa [#allocation9], 1 }
 0x2e0   :  { %1341 = vsyncpa [#allocation4], 1 }
 0x2e1   :  { %1343 = vsyncpa [#allocation4 + $0x1], 1 }
 0x2e2   :  { %1344 = vsyncpa [#allocation12], 1 }
 0x2e3   :  { %1346 = vsyncpa [#allocation12 + $0x1], 1 }

</bundles_post_ra>
